<compile_context>
chip_gen: v5e
topology: v5e:2x2
jax: 0.10.0
libtpu: 0.0.40
codegen_flags: <defaults>
</compile_context>

<pallas_src>
import functools

import numpy as np
import jax
import jax.numpy as jnp
from jax.experimental import pallas as pl
from jax.experimental.pallas import tpu as pltpu


def _round_up(x, m):
    return (x + m - 1) // m * m


# ----------------------------------------------------------------------------
# Deterministic Fourier-basis conv weights (mirrors create_fourier_kernels)
# ----------------------------------------------------------------------------
def make_fourier_kernels(fft_len, win_len, fbins, win_type="hann", fscale="no"):
    """Returns (kernel_cos, kernel_sin) of shape (fbins, fft_len), window applied."""
    if fscale != "no":
        raise NotImplementedError("only fscale='no' is implemented")
    if win_type != "hann":
        raise NotImplementedError("only win_type='hann' is implemented")
    s = np.arange(fft_len, dtype=np.float64)
    k = np.arange(fbins, dtype=np.float64)
    phase = 2.0 * np.pi * np.outer(k, s) / float(fft_len)     # (F, L)
    wcos = np.cos(phase)
    wsin = np.sin(phase)

    # periodic hann, as scipy.signal.get_window('hann', win_len, fftbins=True)
    n = np.arange(win_len, dtype=np.float64)
    win = 0.5 - 0.5 * np.cos(2.0 * np.pi * n / float(win_len))
    win_full = np.zeros(fft_len, dtype=np.float64)
    lpad = (fft_len - win_len) // 2
    win_full[lpad:lpad + win_len] = win

    kernel_cos = (wcos * win_full[None, :]).astype(np.float32)
    kernel_sin = (wsin * win_full[None, :]).astype(np.float32)
    return kernel_cos, kernel_sin


# ----------------------------------------------------------------------------
# Pallas kernel: scratch-free framing, n_full accumulating MXU matmuls
# ----------------------------------------------------------------------------
def _stft_kernel(z_ref, k_ref, out_ref, *, hop, t_tile, n_full, rem):
    # z_ref:   (rows_pb, hop)  hop-chunked padded signal for this (bc, T tile)
    # k_ref:   (fft_len, Fp)   fused [cos | sin | 0-pad] Fourier weights
    # out_ref: (t_tile, Fp)    f32 real|imag (pre-slice)
    wrote = False
    for j in range(n_full):
        p = jnp.dot(z_ref[j:j + t_tile, :],
                    k_ref[j * hop:(j + 1) * hop, :],
                    preferred_element_type=jnp.float32)
        if wrote:
            out_ref[...] += p
        else:
            out_ref[...] = p
            wrote = True
    if rem:
        p = jnp.dot(z_ref[n_full:n_full + t_tile, :rem],
                    k_ref[n_full * hop:n_full * hop + rem, :],
                    preferred_element_type=jnp.float32)
        if wrote:
            out_ref[...] += p
        else:
            out_ref[...] = p


# ----------------------------------------------------------------------------
# Wrapper reproducing StftConv.forward
# ----------------------------------------------------------------------------
def stft_conv(x, *, fft_len=64, win_len=None, win_hop=None, win_type="hann",
              fbins=None, fscale="no", pad_center=True, pad_mode="reflect",
              feature_type="complex", trainable=False,
              t_block=None, compute_dtype=jnp.bfloat16):
    if feature_type not in ("complex", "magnitude", "phase"):
        raise ValueError("feature_type must be 'complex', 'magnitude' or 'phase'")
    if win_len is None:
        win_len = fft_len
    if win_hop is None:
        win_hop = win_len // 4
    hop = int(win_hop)
    out_bins = fft_len // 2 + 1 if fbins is None else fbins
    pad_amount = fft_len // 2

    x = jnp.asarray(x, jnp.float32)
    ndim_ori = x.ndim
    shape_ori = x.shape

    # broadcast_dim: (N,) -> (1,N); (B,N) -> (B,N); (B,C,N) -> (B*C,N)
    if ndim_ori == 1:
        z = x[None, :]
    elif ndim_ori == 2:
        z = x
    elif ndim_ori == 3:
        B, C, N = shape_ori
        z = x.reshape(B * C, N)
    else:
        raise ValueError("expected input of rank 1, 2 or 3")

    if pad_center:
        if pad_mode == "constant":
            z = jnp.pad(z, ((0, 0), (pad_amount, pad_amount)), mode="constant")
        elif pad_mode == "reflect":
            if shape_ori[-1] < pad_amount:
                raise AssertionError(
                    "signal length must exceed fft_len // 2 for reflect padding")
            z = jnp.pad(z, ((0, 0), (pad_amount, pad_amount)), mode="reflect")
        else:
            raise ValueError(f"unknown pad_mode {pad_mode}")

    BC, Npad = z.shape
    n_frames = (Npad - fft_len) // hop + 1
    if n_frames <= 0:
        raise ValueError("signal too short for the requested fft_len / win_hop")

    n_full = fft_len // hop
    rem = fft_len % hop
    extra_rows = max(n_full + (1 if rem else 0) - 1, 0)

    fp = _round_up(2 * out_bins, 128)                   # lane-dense [real|imag] width
    in_itemsize = jnp.dtype(compute_dtype).itemsize
    sub_in = 16 if in_itemsize == 2 else 8
    lane_hop = _round_up(hop, 128)

    # ---- generation-aware VMEM budget --------------------------------------
    try:
        vmem_cap = int(pltpu.get_tpu_info().vmem_capacity_bytes)
    except Exception:
        vmem_cap = 64 * 1024 * 1024                     # conservative (v7x per-core)
    if vmem_cap <= 0:
        vmem_cap = 64 * 1024 * 1024
    budget = int(vmem_cap * 0.45)

    # ---- constant Fourier weight: single-buffer when it is big -------------
    kmat_bytes = _round_up(fft_len, sub_in) * fp * in_itemsize
    k_bufs = 2
    k_index_map = lambda bc, tb: (0, 0)
    k_spec = pl.BlockSpec((fft_len, fp), k_index_map)
    if kmat_bytes > (4 << 20):
        try:
            k_spec = pl.BlockSpec((fft_len, fp), k_index_map,
                                  pipeline_mode=pl.Buffered(1))
            k_bufs = 1
        except Exception:
            k_spec = pl.BlockSpec((fft_len, fp), k_index_map)
            k_bufs = 2

    def est_bytes(tt):
        rows = _round_up(tt + extra_rows, sub_in)
        in_blk = rows * lane_hop * in_itemsize
        out_blk = tt * fp * 4
        # 2x double-buffered pipelined in/out blocks + weight buffer(s) +
        # headroom for the f32 matmul partial product and sliced LHS temps.
        return 2 * in_blk + 2 * out_blk + k_bufs * kmat_bytes + out_blk + 2 * in_blk

    # ---- frame-axis (T) tiling ----------------------------------------------
    if t_block is None:
        t_tile = min(_round_up(n_frames, 8), 512)
    else:
        t_tile = max(8, _round_up(int(t_block), 8))
    while t_tile > 8 and est_bytes(t_tile) > budget:
        t_tile = max(8, _round_up(t_tile // 2, 8))

    n_tb = -(-n_frames // t_tile)
    if BC == 1 and n_tb == 1 and n_frames > 8:
        # give the v7x megacore (and the pipeline) at least 2 grid steps
        t_tile = _round_up(-(-n_frames // 2), 8)
        n_tb = -(-n_frames // t_tile)

    rows_pb = _round_up(t_tile + extra_rows, 8)
    rows_total = (n_tb - 1) * t_tile + rows_pb
    npad2 = rows_total * hop

    # hop-chunked, zero-padded signal, then gather per-T-tile row windows so the
    # pipelined input blocks are non-overlapping (the fft_len-hop overlap between
    # adjacent tiles is duplicated once in HBM -- a few percent of the input).
    n_keep = min(Npad, npad2)
    z_full = jnp.zeros((BC, npad2), jnp.float32).at[:, :n_keep].set(z[:, :n_keep])
    z2d = z_full.reshape(BC, rows_total, hop)
    row_idx = np.arange(n_tb)[:, None] * t_tile + np.arange(rows_pb)[None, :]
    z3 = z2d[:, row_idx, :].astype(compute_dtype)       # (BC, n_tb, rows_pb, hop)

    # fused [cos | sin | 0] Fourier weights, lane padded
    kcos_np, ksin_np = make_fourier_kernels(fft_len, win_len, out_bins, win_type, fscale)
    k_np = np.zeros((fft_len, fp), dtype=np.float32)
    k_np[:, :out_bins] = kcos_np.T
    k_np[:, out_bins:2 * out_bins] = ksin_np.T
    kmat = jnp.asarray(k_np).astype(compute_dtype)

    est = est_bytes(t_tile)
    vmem_limit = int(min(vmem_cap * 0.9, max(2 * est, 32 * 1024 * 1024)))

    kernel = functools.partial(_stft_kernel, hop=hop, t_tile=t_tile,
                               n_full=n_full, rem=rem)
    cost = pl.CostEstimate(
        flops=int(2 * BC * n_tb * t_tile * fft_len * fp),
        transcendentals=0,
        bytes_accessed=int(z3.size * in_itemsize + kmat.size * in_itemsize
                           + BC * n_tb * t_tile * fp * 4),
    )

    out = pl.pallas_call(
        kernel,
        out_shape=jax.ShapeDtypeStruct((BC, n_tb * t_tile, fp), jnp.float32),
        grid=(BC, n_tb),
        in_specs=[
            pl.BlockSpec((None, None, rows_pb, hop), lambda bc, tb: (bc, tb, 0, 0)),
            k_spec,
        ],
        out_specs=pl.BlockSpec((None, t_tile, fp), lambda bc, tb: (bc, tb, 0)),
        compiler_params=pltpu.CompilerParams(
            dimension_semantics=("parallel", "parallel"),
            vmem_limit_bytes=vmem_limit),
        cost_estimate=cost,
    )(z3, kmat)

    # (BC, T_tot, Fp) -> real/imag in torch conv1d layout (BC, F, T)
    out = out[:, :n_frames, :]
    z_real = jnp.transpose(out[..., :out_bins], (0, 2, 1))
    z_imag = jnp.transpose(out[..., out_bins:2 * out_bins], (0, 2, 1))

    # reshape_dim: restore original leading dims
    if ndim_ori == 1:
        z_real = z_real[0]
        z_imag = z_imag[0]
    elif ndim_ori == 3:
        B, C, _ = shape_ori
        z_real = z_real.reshape(B, C, out_bins, n_frames)
        z_imag = z_imag.reshape(B, C, out_bins, n_frames)

    if feature_type == "magnitude":
        m = z_real * z_real + z_imag * z_imag
        if trainable:
            m = m + 1e-8
        return jnp.sqrt(m)
    elif feature_type == "complex":
        return jnp.stack((z_real, -z_imag), axis=-1)
    else:  # phase
        return jnp.arctan2(-z_imag + 0.0, z_real)


# ----------------------------------------------------------------------------
# float64 numpy reference (correctness checking only)
# ----------------------------------------------------------------------------
def _reference(x, fft_len, win_hop):
    x = np.asarray(x, np.float64)
    fbins = fft_len // 2 + 1
    pad = fft_len // 2
    B, C, N = x.shape
    z = np.pad(x.reshape(B * C, N), ((0, 0), (pad, pad)), mode="reflect")
    T = (z.shape[-1] - fft_len) // win_hop + 1
    idx = np.arange(T)[:, None] * win_hop + np.arange(fft_len)[None, :]
    frames = z[:, idx]                                   # (BC, T, L)
    kcos, ksin = make_fourier_kernels(fft_len, fft_len, fbins)
    real = np.einsum("btl,fl->bft", frames, kcos.astype(np.float64))
    imag = np.einsum("btl,fl->bft", frames, ksin.astype(np.float64))
    real = real.reshape(B, C, fbins, T)
    imag = imag.reshape(B, C, fbins, T)
    return np.stack((real, -imag), axis=-1).astype(np.float32)


if __name__ == "__main__":
    key = jax.random.PRNGKey(0)
    B, C, N = 2, 3, 256
    fft_len = 64                     # -> fbins = 33, win_hop = 16, 17 frames
    x = jax.random.normal(key, (B, C, N), dtype=jnp.float32)

    ref = _reference(np.asarray(x), fft_len, fft_len // 4)

    # float32 MXU path: tight tolerance
    out_f32 = jax.block_until_ready(
        stft_conv(x, fft_len=fft_len, feature_type="complex",
                  compute_dtype=jnp.float32))
    assert out_f32.shape == (B, C, fft_len // 2 + 1, (N // (fft_len // 4)) + 1, 2)
    np.testing.assert_allclose(np.asarray(out_f32), ref, rtol=2e-3, atol=2e-3)

    # default bfloat16 MXU path: looser tolerance (bf16 inputs, f32 accumulation)
    out_bf16 = jax.block_until_ready(
        stft_conv(x, fft_len=fft_len, feature_type="complex"))
    err = np.max(np.abs(np.asarray(out_bf16) - ref)) / (np.max(np.abs(ref)) + 1e-12)
    assert err < 5e-2, f"bf16 relative error too large: {err}"

    # magnitude epilogue
    mag = jax.block_until_ready(
        stft_conv(x, fft_len=fft_len, feature_type="magnitude",
                  compute_dtype=jnp.float32))
    mag_ref = np.sqrt(ref[..., 0] ** 2 + ref[..., 1] ** 2)
    np.testing.assert_allclose(np.asarray(mag), mag_ref, rtol=2e-3, atol=2e-3)

    print("KERNEL_OK")
</pallas_src>

<mosaic_0001>
module attributes {stable_mosaic.version = 11 : i64} {
  func.func @_stft_kernel(%arg0: i32, %arg1: i32, %arg2: memref<1x1x32x16xf32, #tpu.memory_space<vmem>>, %arg3: memref<64x128xf32, #tpu.memory_space<vmem>>, %arg4: memref<1x24x128xf32, #tpu.memory_space<vmem>>) attributes {dimension_semantics = [#tpu.dimension_semantics<parallel>, #tpu.dimension_semantics<parallel>], iteration_bounds = array<i64: 6, 1>, scalar_prefetch = 0 : i64, scratch_operands = 0 : i64, tpu.core_type = #tpu.core_type<tc>, window_params = [{transform_indices = @transform_0, window_bounds = array<i64: 1, 1, 32, 16>}, {pipeline_mode = #tpu.pipeline_mode<synchronous>, transform_indices = @transform_1, window_bounds = array<i64: 64, 128>}, {transform_indices = @transform_2, window_bounds = array<i64: 1, 24, 128>}]} {
    %c0 = arith.constant 0 : index
    %c0_0 = arith.constant 0 : index
    %c0_1 = arith.constant 0 : index
    %c0_2 = arith.constant 0 : index
    %0 = vector.load %arg2[%c0, %c0_0, %c0_1, %c0_2] : memref<1x1x32x16xf32, #tpu.memory_space<vmem>>, vector<1x1x24x16xf32>
    %1 = vector.shape_cast %0 : vector<1x1x24x16xf32> to vector<24x16xf32>
    %c0_3 = arith.constant 0 : index
    %c0_4 = arith.constant 0 : index
    %2 = vector.load %arg3[%c0_3, %c0_4] : memref<64x128xf32, #tpu.memory_space<vmem>>, vector<16x128xf32>
    %cst = arith.constant dense<0.000000e+00> : vector<24x128xf32>
    %3 = tpu.matmul %1, %2, %cst {dimension_numbers = #tpu.dot_dimension_numbers<[1], [0], [0], [1], [0, 0, 1, 1], [], []>} : vector<24x16xf32>, vector<16x128xf32>, vector<24x128xf32> -> vector<24x128xf32>
    %c0_5 = arith.constant 0 : index
    %c0_6 = arith.constant 0 : index
    %c0_7 = arith.constant 0 : index
    %4 = vector.load %arg4[%c0_5, %c0_6, %c0_7] : memref<1x24x128xf32, #tpu.memory_space<vmem>>, vector<1x24x128xf32>
    %5 = vector.shape_cast %4 : vector<1x24x128xf32> to vector<24x128xf32>
    %6 = vector.shape_cast %3 : vector<24x128xf32> to vector<1x24x128xf32>
    tpu.vector_store %arg4[%c0_5, %c0_6, %c0_7], %6 {strides = array<i32>} : memref<1x24x128xf32, #tpu.memory_space<vmem>>, vector<1x24x128xf32>,
    %c0_8 = arith.constant 0 : index
    %c0_9 = arith.constant 0 : index
    %c1 = arith.constant 1 : index
    %c0_10 = arith.constant 0 : index
    %7 = vector.load %arg2[%c0_8, %c0_9, %c1, %c0_10] : memref<1x1x32x16xf32, #tpu.memory_space<vmem>>, vector<1x1x24x16xf32>
    %8 = vector.shape_cast %7 : vector<1x1x24x16xf32> to vector<24x16xf32>
    %c16 = arith.constant 16 : index
    %c0_11 = arith.constant 0 : index
    %9 = vector.load %arg3[%c16, %c0_11] : memref<64x128xf32, #tpu.memory_space<vmem>>, vector<16x128xf32>
    %cst_12 = arith.constant dense<0.000000e+00> : vector<24x128xf32>
    %10 = tpu.matmul %8, %9, %cst_12 {dimension_numbers = #tpu.dot_dimension_numbers<[1], [0], [0], [1], [0, 0, 1, 1], [], []>} : vector<24x16xf32>, vector<16x128xf32>, vector<24x128xf32> -> vector<24x128xf32>
    %c0_13 = arith.constant 0 : index
    %c0_14 = arith.constant 0 : index
    %c0_15 = arith.constant 0 : index
    %11 = vector.load %arg4[%c0_13, %c0_14, %c0_15] : memref<1x24x128xf32, #tpu.memory_space<vmem>>, vector<1x24x128xf32>
    %12 = vector.shape_cast %11 : vector<1x24x128xf32> to vector<24x128xf32>
    %13 = arith.addf %12, %10 : vector<24x128xf32>
    %c0_16 = arith.constant 0 : index
    %c0_17 = arith.constant 0 : index
    %c0_18 = arith.constant 0 : index
    %14 = vector.load %arg4[%c0_16, %c0_17, %c0_18] : memref<1x24x128xf32, #tpu.memory_space<vmem>>, vector<1x24x128xf32>
    %15 = vector.shape_cast %14 : vector<1x24x128xf32> to vector<24x128xf32>
    %16 = vector.shape_cast %13 : vector<24x128xf32> to vector<1x24x128xf32>
    tpu.vector_store %arg4[%c0_16, %c0_17, %c0_18], %16 {strides = array<i32>} : memref<1x24x128xf32, #tpu.memory_space<vmem>>, vector<1x24x128xf32>,
    %c0_19 = arith.constant 0 : index
    %c0_20 = arith.constant 0 : index
    %c2 = arith.constant 2 : index
    %c0_21 = arith.constant 0 : index
    %17 = vector.load %arg2[%c0_19, %c0_20, %c2, %c0_21] : memref<1x1x32x16xf32, #tpu.memory_space<vmem>>, vector<1x1x24x16xf32>
    %18 = vector.shape_cast %17 : vector<1x1x24x16xf32> to vector<24x16xf32>
    %c32 = arith.constant 32 : index
    %c0_22 = arith.constant 0 : index
    %19 = vector.load %arg3[%c32, %c0_22] : memref<64x128xf32, #tpu.memory_space<vmem>>, vector<16x128xf32>
    %cst_23 = arith.constant dense<0.000000e+00> : vector<24x128xf32>
    %20 = tpu.matmul %18, %19, %cst_23 {dimension_numbers = #tpu.dot_dimension_numbers<[1], [0], [0], [1], [0, 0, 1, 1], [], []>} : vector<24x16xf32>, vector<16x128xf32>, vector<24x128xf32> -> vector<24x128xf32>
    %c0_24 = arith.constant 0 : index
    %c0_25 = arith.constant 0 : index
    %c0_26 = arith.constant 0 : index
    %21 = vector.load %arg4[%c0_24, %c0_25, %c0_26] : memref<1x24x128xf32, #tpu.memory_space<vmem>>, vector<1x24x128xf32>
    %22 = vector.shape_cast %21 : vector<1x24x128xf32> to vector<24x128xf32>
    %23 = arith.addf %22, %20 : vector<24x128xf32>
    %c0_27 = arith.constant 0 : index
    %c0_28 = arith.constant 0 : index
    %c0_29 = arith.constant 0 : index
    %24 = vector.load %arg4[%c0_27, %c0_28, %c0_29] : memref<1x24x128xf32, #tpu.memory_space<vmem>>, vector<1x24x128xf32>
    %25 = vector.shape_cast %24 : vector<1x24x128xf32> to vector<24x128xf32>
    %26 = vector.shape_cast %23 : vector<24x128xf32> to vector<1x24x128xf32>
    tpu.vector_store %arg4[%c0_27, %c0_28, %c0_29], %26 {strides = array<i32>} : memref<1x24x128xf32, #tpu.memory_space<vmem>>, vector<1x24x128xf32>,
    %c0_30 = arith.constant 0 : index
    %c0_31 = arith.constant 0 : index
    %c3 = arith.constant 3 : index
    %c0_32 = arith.constant 0 : index
    %27 = vector.load %arg2[%c0_30, %c0_31, %c3, %c0_32] : memref<1x1x32x16xf32, #tpu.memory_space<vmem>>, vector<1x1x24x16xf32>
    %28 = vector.shape_cast %27 : vector<1x1x24x16xf32> to vector<24x16xf32>
    %c48 = arith.constant 48 : index
    %c0_33 = arith.constant 0 : index
    %29 = vector.load %arg3[%c48, %c0_33] : memref<64x128xf32, #tpu.memory_space<vmem>>, vector<16x128xf32>
    %cst_34 = arith.constant dense<0.000000e+00> : vector<24x128xf32>
    %30 = tpu.matmul %28, %29, %cst_34 {dimension_numbers = #tpu.dot_dimension_numbers<[1], [0], [0], [1], [0, 0, 1, 1], [], []>} : vector<24x16xf32>, vector<16x128xf32>, vector<24x128xf32> -> vector<24x128xf32>
    %c0_35 = arith.constant 0 : index
    %c0_36 = arith.constant 0 : index
    %c0_37 = arith.constant 0 : index
    %31 = vector.load %arg4[%c0_35, %c0_36, %c0_37] : memref<1x24x128xf32, #tpu.memory_space<vmem>>, vector<1x24x128xf32>
    %32 = vector.shape_cast %31 : vector<1x24x128xf32> to vector<24x128xf32>
    %33 = arith.addf %32, %30 : vector<24x128xf32>
    %c0_38 = arith.constant 0 : index
    %c0_39 = arith.constant 0 : index
    %c0_40 = arith.constant 0 : index
    %34 = vector.load %arg4[%c0_38, %c0_39, %c0_40] : memref<1x24x128xf32, #tpu.memory_space<vmem>>, vector<1x24x128xf32>
    %35 = vector.shape_cast %34 : vector<1x24x128xf32> to vector<24x128xf32>
    %36 = vector.shape_cast %33 : vector<24x128xf32> to vector<1x24x128xf32>
    tpu.vector_store %arg4[%c0_38, %c0_39, %c0_40], %36 {strides = array<i32>} : memref<1x24x128xf32, #tpu.memory_space<vmem>>, vector<1x24x128xf32>,
    return
  }
  func.func @transform_0(%arg0: i32, %arg1: i32) -> (i32, i32, i32, i32) {
    %c0_i32 = arith.constant 0 : i32
    %c0_i32_0 = arith.constant 0 : i32
    %c0_i32_1 = arith.constant 0 : i32
    return %arg0, %arg1, %c0_i32, %c0_i32_0 : i32, i32, i32, i32
  }
  func.func @transform_1(%arg0: i32, %arg1: i32) -> (i32, i32) {
    %c0_i32 = arith.constant 0 : i32
    %c0_i32_0 = arith.constant 0 : i32
    %c0_i32_1 = arith.constant 0 : i32
    return %c0_i32, %c0_i32_0 : i32, i32
  }
  func.func @transform_2(%arg0: i32, %arg1: i32) -> (i32, i32, i32) {
    %c0_i32 = arith.constant 0 : i32
    %c0_i32_0 = arith.constant 0 : i32
    return %arg0, %arg1, %c0_i32 : i32, i32, i32
  }
}

</mosaic_0001>

<bundles_post_ra>
// kernel: tpu_custom_call.1
= control target key start
LH: loop header
LB: loop body
LE: loop exit
PB: predicated region body
PF: predicated region fallthrough
CT: control target
= control target key end

     0   :  { %7 = vsyncpa [#allocation3], 0  ;;  %s778_s0 = inlined_call_operand.vmem [shape: f32[6,1,32,16], index: 0, kind: input, shape index: {}]   ;;  %s779_s1 = inlined_call_operand.vmem [shape: f32[64,128], index: 1, kind: input, shape index: {}]   ;;  %s780_s2 = inlined_call_operand.hbm [shape: f32[6,24,128], index: 2, kind: output, shape index: {}]  }
   0x1   :  { %9 = vsyncpa [#allocation3 + $0x1], 0  ;;  %s641_s9 = smov 0   ;;  %s643_s10 = smov 0  }
   0x2   :  { %s645_s11 = smov 0   ;;  %s647_s12 = smov 0  }
   0x3   :  { %s649_s13 = smov 0   ;;  %s651_s14 = smov 0  }
   0x4 LB: > { %s462_s15 = sadd.s32 4294967295, %s622_s14   ;;  %s463_s16 = sadd.s32 4294967294, %s622_s14   ;;  %s622_s14 = sphi %s651_s14, %s15_s14   ;;  %s618_s13 = sphi %s649_s13, %s787_s13   ;;  %s614_s12 = sphi %s647_s12, %s786_s12   ;;  %s610_s11 = sphi %s645_s11, %s785_s11   ;;  %s606_s10 = sphi %s643_s10, %s784_s10   ;;  %s602_s9 = sphi %s641_s9, %s783_s9  }
   0x5   : > { %s27_s17 = sadd.s32 1, %s618_s13  ;;  %s85_s18 = sadd.s32 1, %s610_s11 }
   0x6   : > { %p29_p0 = scmp.ge.s32.totalorder %s27_s17, 6  ;;  %p95_p1 = scmp.ne.s32.totalorder %s610_s11, %s606_s10 }
   0x7   : > { %p96_p2 = scmp.eq.s32.totalorder %s462_s15, 5  ;;  %p101_p3 = scmp.ne.s32.totalorder %s606_s10, %s602_s9 }
   0x8   : > { %s789_s17 = smov (%p29_p0, %s27_s17), 0  ;;  %p102_p5 = scmp.eq.s32.totalorder %s463_s16, 5 }
   0x9   : > { %p681_p4 = por %p96_p2, %p95_p1  ;;  %s80_s20 = ssub.s32 %s618_s13, %s789_s17 }
   0xa   : > { %p466_p6 = scmp.ge.s32.totalorder %s622_s14, 1  ;;  %p83_p7 = scmp.eq.s32.totalorder %s80_s20, 0 }
   0xb   : > { %p688_p8 = por %p102_p5, %p101_p3  ;;  %p135_p9 = scmp.lt.s32.totalorder %s622_s14, 7 }
   0xc   : > { %s694_s22 = scalar_select %p83_p7, %s610_s11, %s85_s18  }
   0xd   : > { %p136_p10 = pnand %p466_p6, %p135_p9 }
   0xe   : > { %p161_p11 = scmp.lt.s32.totalorder (!%p136_p10), %s614_s12, 5  ;;  %s158_s26 = sand.u32 (!%p136_p10), 1, %s606_s10  }
   0xf   : > { %139 = sbr.rel (%p136_p10) target bundleno = 183 (0xb7), region = 28  ;;  %s564_s18 = scalar_lea.hbm (!%p136_p10), %s780_s2, 144 }
  0x10   : > { %s485_s27 = smul.u32 (!%p136_p10), 24, %s158_s26 }
  0x11   : > { %s486_s29 = smul.u32 (!%p136_p10), 24, %s614_s12 }
  0x12   : > { %s160_s28 = scalar_lea.vmem (!%p136_p10), [#allocation2], %s485_s27 }
  0x13   : > { %s376_s4 = scalar_lea.hbm (!%p136_p10), %s780_s2, %s486_s29  ;;  %s377_s5 = sshll.u32 (!%p136_p10), %s160_s28, 4  ;;  %s378_s5 = int_to_ptr.vmem [resolvable:$true] %s377_s5 }
  0x14   : > { %v175_v0 = vld [vmem:[%s779_s1 + $0x8] sm:$0xff]  ;;  %v174_v1 = vld [vmem:[%s779_s1] sm:$0xff]  ;;  %v219_v2 = vld [vmem:[%s779_s1 + $0x18] sm:$0xff]  ;;  %s162_s7 = scalar_select %p161_p11, %s614_s12, 5  ;;  %vm176_vm0 = vcmask 130048  }
  0x15   : > { %200 = vmatpush.msra.mxu0 %v175_v0  ;;  %243 = vmatpush.msra.mxu1 %v219_v2  ;;  %v218_v3 = vld [vmem:[%s779_s1 + $0x10] sm:$0xff]  ;;  %v268_v4 = vld [vmem:[%s779_s1 + $0x28] sm:$0xff]  ;;  %v267_v5 = vld [vmem:[%s779_s1 + $0x20] sm:$0xff]  ;;  %s379_s6 = sshll.u32 %s376_s4, 4  ;;  %s363_s12 = scalar_lea.sflag [#allocation3], %s158_s26  ;;  %s380_s6 = int_to_ptr.hbm [resolvable:$true] %s379_s6 }
  0x16   : > { %292 = vmatpush.msra.mxu2 %v268_v4  ;;  %v317_v6 = vld [vmem:[%s779_s1 + $0x38] sm:$0xff]  ;;  %v316_v7 = vld [vmem:[%s779_s1 + $0x30] sm:$0xff]  ;;  %s484_s20 = sshll.u32 %s162_s7, 5  ;;  %s558_s7 = sshra.s32 %s380_s6, 4  ;;  %s559_s7 = int_to_ptr.hbm [resolvable:$true] %s558_s7 }
  0x17   : > { %201 = vmatpush.msra.mxu0 %v174_v1  ;;  %244 = vmatpush.msra.mxu1 %v218_v3  ;;  %s169_s25 = scalar_lea.vmem %s778_s0, %s484_s20  ;;  %s560_s8 = scalar_lea.hbm %s559_s7, 24 }
  0x18   : > { %293 = vmatpush.msra.mxu2 %v267_v5  ;;  %341 = vmatpush.msra.mxu3 %v317_v6  ;;  %v171_v8 = vld [vmem:[%s169_s25] sm:$0xff]  ;;  %v172_v12 = vld [vmem:[%s169_s25 + $0x8] sm:$0xff]  ;;  %v173_v16 = vld [vmem:[%s169_s25 + $0x10] sm:$0xff]  ;;  %p561_p12 = scmp.ne.s32.totalorder %s559_s7, %s560_s8  ;;  %p565_p1 = scmp.lt.s32.totalorder %s559_s7, %s780_s2 }
  0x19   : > { %v215_v9 = vld [vmem:[%s169_s25 + $0x1] sm:$0xff]  ;;  %469 = vmatmul.msk.f32.vlgmr.msra.gmra.mxu0 %vm176_vm0, %v171_v8  ;;  %v216_v13 = vld [vmem:[%s169_s25 + $0x9] sm:$0xff]  ;;  %v217_v17 = vld [vmem:[%s169_s25 + $0x11] sm:$0xff]  ;;  %p566_p2 = scmp.lt.s32.totalorder %s564_s18, %s560_s8 }
  0x1a   : > { %342 = vmatpush.msra.mxu3 %v316_v7  ;;  %472 = vmatmul.msk.f32.vlgmr.msra.gmra.mxu1 %vm176_vm0, %v215_v9  ;;  %v264_v10 = vld [vmem:[%s169_s25 + $0x2] sm:$0xff]  ;;  %v265_v14 = vld [vmem:[%s169_s25 + $0xa] sm:$0xff]  ;;  %v266_v18 = vld [vmem:[%s169_s25 + $0x12] sm:$0xff]  ;;  %p562_p13 = pnand %p561_p12, %p681_p4 }
  0x1b   : > { %475 = vmatmul.msk.f32.vlgmr.msra.gmra.mxu2 %vm176_vm0, %v264_v10  ;;  %v313_v11 = vld [vmem:[%s169_s25 + $0x3] sm:$0xff]  ;;  %v314_v15 = vld [vmem:[%s169_s25 + $0xb] sm:$0xff]  ;;  %v315_v19 = vld [vmem:[%s169_s25 + $0x13] sm:$0xff]  ;;  %p567_p3 = por %p566_p2, %p565_p1 }
  0x1c   : > { %478 = vmatmul.msk.f32.vlgmr.msra.gmra.mxu3 %vm176_vm0, %v313_v11  ;;  %p563_p0 = pneg %p562_p13 }
  0x1e   : > { %p568_p5 = pnand %p567_p3, %p563_p0 }
  0x21   : > { %470 = vmatmul.msk.f32.gmra.mxu0 %vm176_vm0, %v172_v12 }
  0x22   : > { %473 = vmatmul.msk.f32.gmra.mxu1 %vm176_vm0, %v216_v13 }
  0x23   : > { %476 = vmatmul.msk.f32.gmra.mxu2 %vm176_vm0, %v265_v14 }
  0x24   : > { %479 = vmatmul.msk.f32.gmra.mxu3 %vm176_vm0, %v314_v15 }
  0x29   : > { %471 = vmatmul.msk.f32.gmra.mxu0 %vm176_vm0, %v173_v16 }
  0x2a   : > { %474 = vmatmul.msk.f32.gmra.mxu1 %vm176_vm0, %v217_v17 }
  0x2b   : > { %477 = vmatmul.msk.f32.gmra.mxu2 %vm176_vm0, %v266_v18 }
  0x2c   : > { %480 = vmatmul.msk.f32.gmra.mxu3 %vm176_vm0, %v315_v19 }
  0x96   : > { %v203_v20 = vpop.f32.mrf.mxu0 }
  0x97   : > { %v246_v21 = vpop.f32.mrf.mxu1 }
  0x98   : > { %v258_v22 = vadd.f32 %v246_v21, %v203_v20 }
  0x9e   : > { %v295_v23 = vpop.f32.mrf.mxu2  ;;  %v206_v24 = vpop.f32.mrf.mxu0 }
  0x9f   : > { %v249_v25 = vpop.f32.mrf.mxu1  ;;  %v307_v26 = vadd.f32 %v295_v23, %v258_v22  ;;  %v344_v27 = vpop.f32.mrf.mxu3 }
  0xa0   : > { %v259_v29 = vadd.f32 %v249_v25, %v206_v24 }
  0xa1   : > { %v356_v28 = vadd.f32 %v344_v27, %v307_v26 }
  0xa3   : > { %359 = vst [vmem:[%s160_s28] sm:$0xff] %v356_v28 }
  0xa6   : > { %v298_v30 = vpop.f32.mrf.mxu2  ;;  %v209_v31 = vpop.f32.mrf.mxu0 }
  0xa7   : > { %v308_v32 = vadd.f32 %v298_v30, %v259_v29  ;;  %v252_v33 = vpop.f32.mrf.mxu1  ;;  %v347_v34 = vpop.f32.mrf.mxu3 }
  0xa8   : > { %v260_v36 = vadd.f32 %v252_v33, %v209_v31 }
  0xa9   : > { %v357_v35 = vadd.f32 %v347_v34, %v308_v32 }
  0xab   : > { %360 = vst [vmem:[%s160_s28 + $0x8] sm:$0xff] %v357_v35 }
  0xae   : > { %v301_v37 = vpop.f32.mrf.mxu2 }
  0xaf   : > { %v309_v38 = vadd.f32 %v301_v37, %v260_v36  ;;  %v350_v39 = vpop.f32.mrf.mxu3 }
  0xb1   : > { %v358_v40 = vadd.f32 %v350_v39, %v309_v38 }
  0xb3   : > { %361 = vst [vmem:[%s160_s28 + $0x10] sm:$0xff] %v358_v40 }
  0xb4   : > { %571 = shalt.err (!%p568_p5)
}
  0xb5   : > { %s624_s24 = smov 128   ;;  %s625_s25 = smov 8  }
  0xb6   : > { %487 = dma.vmem_to_hbm [thread:$0]  (%p681_p4), %s378_s5, 384, %s380_s6, %s363_s12, %s624_s24, %s624_s24, %s625_s25  }
  0xb7 PF: > { %p493_p6 = scmp.ge.s32.totalorder %s622_s14, 2  ;;  %s394_s26 = sand.u32 1, %s602_s9  }
  0xb8   : > { %s395_s27 = scalar_lea.sflag [#allocation3], %s394_s26 }
  0xb9   : > { %p490_p7 = pnand %p493_p6, %p688_p8 }
  0xbb   : > { %p491_p9 = pneg %p490_p7 }
  0xbd   : > { %597 = dma.done.wait (%p491_p9), %s395_s27, 384  }
  0xbe   : > { %599 = vsyncadd (%p491_p9), %s395_s27, 4294966912  ;;  %s15_s14 = sadd.s32 1, %s622_s14   ;;  %s783_s9 = smov %s606_s10 }
  0xbf   : > { %p12_p10 = scmp.ge.s32.totalorder %s15_s14, 8   ;;  %s784_s10 = smov %s610_s11 }
  0xc0   : > { %s785_s11 = smov %s694_s22  ;;  %s786_s12 = smov %s618_s13 }
  0xc1   : > { %s787_s13 = smov %s789_s17  ;;  %14 = sbr.rel (!%p12_p10) target bundleno = 4 (0x4), region = 63 }
  0xc6   :  { %401 = vsyncpa [#allocation3], 1 }
  0xc7   :  { %403 = vsyncpa [#allocation3 + $0x1], 1 }

</bundles_post_ra>
